<compile_context>
chip_gen: v6e
topology: v6e:2x2x1
jax: 0.10.0
libtpu: 0.0.40
codegen_flags: <defaults>
</compile_context>

<pallas_src>
import jax
import jax.numpy as jnp
from jax.experimental import pallas as pl
from jax.experimental.pallas import tpu as pltpu

# ---- Config (synthetic, small) ----------------------------------------------
HIDDEN_SIZE = 32      # __C.HIDDEN_SIZE
FLAT_MLP_SIZE = 64    # __C.FLAT_MLP_SIZE
FLAT_GLIMPSES = 2     # __C.FLAT_GLIMPSES
FLAT_OUT_SIZE = 64    # __C.FLAT_OUT_SIZE
# DROPOUT_R is only active in training; forward here is inference (no-op).

NEG_INF_FILL = -1e9
LANE = 128
SUBLANE = 8


def _round_up(v, m):
    return ((v + m - 1) // m) * m


def _choose_batch_tile(B, batch_tile, min_steps=4):
    """Pick a batch tile TB (multiple of 8) giving >= min_steps grid steps
    (when B allows) so both v7x TensorCores get work and the pipeline has a
    steady state, while keeping padding waste < 8 rows per step."""
    n_steps = max(min_steps, pl.cdiv(B, batch_tile))
    tb = _round_up(max(1, pl.cdiv(B, n_steps)), SUBLANE)
    tb = min(tb, _round_up(batch_tile, SUBLANE))
    grid = pl.cdiv(B, tb)
    return tb, grid * tb


def attflat_kernel(x_ref, bias_ref,
                   w1_ref, b1_ref, w2_ref, b2_ref, wm_ref, bm_ref,
                   o_ref):
    """One tile of TB batch rows per grid step.

    x_ref:    (TB, S, H)    input features (f32 or bf16 streaming dtype)
    bias_ref: (TB, S)       additive mask bias, 0.0 valid / -1e9 masked (f32)
    w1/b1:    (H, MID), (1, MID)        MLP.fc.linear
    w2/b2:    (MID, G), (1, G)          MLP.linear
    wm/bm:    (G*H, OUT_P), (1, OUT_P)  linear_merge (columns zero-padded)
    o_ref:    (TB, OUT_P)
    """
    TB, S, H = x_ref.shape
    x = x_ref[...]                                   # [TB, S, H]
    bias = bias_ref[...]                             # [TB, S] f32

    # ---- MLP: Linear -> ReLU -> Linear (dropout is inference no-op) --------
    # Fold batch into the matmul M dim; safe because S is a multiple of 8 and
    # H <= 128, so this reshape never crosses an (8,128) tile boundary.
    x2 = x.reshape(TB * S, H)
    h = jnp.dot(x2, w1_ref[...], preferred_element_type=jnp.float32) + b1_ref[...]
    h = jnp.maximum(h, 0.0)                          # ReLU
    logits2 = jnp.dot(h.astype(w2_ref.dtype), w2_ref[...],
                      preferred_element_type=jnp.float32) + b2_ref[...]
    G = logits2.shape[-1]
    logits = logits2.reshape(TB, S, G)               # [TB, S, G]

    # ---- mask + softmax over the sequence axis (dim=1 in torch) ------------
    # Additive -1e9 bias ~ masked_fill: masked lanes underflow to exactly 0
    # after exp() in f32 as long as at least one position is unmasked.
    logits = logits + bias[:, :, None]
    m = jnp.max(logits, axis=1, keepdims=True)       # [TB, 1, G]
    e = jnp.exp(logits - m)
    denom = jnp.sum(e, axis=1, keepdims=True)        # [TB, 1, G]
    att = e / denom                                  # exact divide (f32)

    # ---- glimpse-weighted sums fused into ONE linear_merge matmul ----------
    # x_atted[b, g*H + h] = sum_s att[b, s, g] * x[b, s, h]
    xf = x.astype(jnp.float32)                       # keep elementwise in f32
    glimpses = [jnp.sum(att[:, :, g:g + 1] * xf, axis=1) for g in range(G)]
    x_atted = jnp.concatenate(glimpses, axis=-1)     # [TB, G*H]
    out = jnp.dot(x_atted.astype(wm_ref.dtype), wm_ref[...],
                  preferred_element_type=jnp.float32) + bm_ref[...]
    o_ref[...] = out.astype(o_ref.dtype)


def att_flat(x, x_mask, params, *, batch_tile=512, matmul_dtype=jnp.float32):
    """x: [B, S, H] float32; x_mask: [B, 1, 1, S] bool (True = masked).

    matmul_dtype=jnp.bfloat16 streams x and the matmul weights in bf16
    (halving the dominant HBM read) while keeping f32 accumulation and f32
    softmax/elementwise math.
    """
    B, S, H = x.shape
    w1, b1, w2, b2, wm, bm = params
    MID = w1.shape[1]
    G = w2.shape[1]
    OUT = wm.shape[1]

    # Lane-dense output: pad merge-weight columns to a multiple of 128.
    OUT_P = _round_up(OUT, LANE)
    if OUT_P != OUT:
        wm_p = jnp.pad(wm, ((0, 0), (0, OUT_P - OUT)))
        bm_p = jnp.pad(bm, ((0, 0), (0, OUT_P - OUT)))
    else:
        wm_p, bm_p = wm, bm

    # 2-D additive mask bias: 0.0 where valid, -1e9 where masked.
    bias = jnp.where(x_mask.reshape(B, S), NEG_INF_FILL, 0.0).astype(jnp.float32)

    # Pad S to a multiple of 8 (padded positions fully masked) so the in-kernel
    # reshapes stay layout-free for any sequence length.
    S_p = _round_up(S, SUBLANE)
    if S_p != S:
        x = jnp.pad(x, ((0, 0), (0, S_p - S), (0, 0)))
        bias = jnp.pad(bias, ((0, 0), (0, S_p - S)),
                       constant_values=NEG_INF_FILL)

    # Adaptive batch tile (multiple of 8, >=4 grid steps when B allows).
    TB, B_pad = _choose_batch_tile(B, batch_tile)
    if B_pad != B:
        x = jnp.pad(x, ((0, B_pad - B), (0, 0), (0, 0)))
        # Padded rows: x=0 + fully-masked bias -> uniform att over zeros -> 0.
        bias = jnp.pad(bias, ((0, B_pad - B), (0, 0)),
                       constant_values=NEG_INF_FILL)

    # Optional bf16 streaming of x and matmul weights (f32 accumulation kept).
    if matmul_dtype != jnp.float32:
        x = x.astype(matmul_dtype)
        w1c = w1.astype(matmul_dtype)
        w2c = w2.astype(matmul_dtype)
        wmc = wm_p.astype(matmul_dtype)
    else:
        w1c, w2c, wmc = w1, w2, wm_p

    out = pl.pallas_call(
        attflat_kernel,
        out_shape=jax.ShapeDtypeStruct((B_pad, OUT_P), jnp.float32),
        grid_spec=pltpu.PrefetchScalarGridSpec(
            num_scalar_prefetch=0,
            grid=(B_pad // TB,),
            in_specs=[
                pl.BlockSpec((TB, S_p, H), lambda b: (b, 0, 0)),   # x
                pl.BlockSpec((TB, S_p), lambda b: (b, 0)),         # mask bias
                pl.BlockSpec((H, MID), lambda b: (0, 0)),          # w1
                pl.BlockSpec((1, MID), lambda b: (0, 0)),          # b1
                pl.BlockSpec((MID, G), lambda b: (0, 0)),          # w2
                pl.BlockSpec((1, G), lambda b: (0, 0)),            # b2
                pl.BlockSpec((G * H, OUT_P), lambda b: (0, 0)),    # wm (padded)
                pl.BlockSpec((1, OUT_P), lambda b: (0, 0)),        # bm (padded)
            ],
            out_specs=pl.BlockSpec((TB, OUT_P), lambda b: (b, 0)),
        ),
        compiler_params=pltpu.CompilerParams(
            dimension_semantics=("parallel",),
            vmem_limit_bytes=48 * 1024 * 1024),
    )(x, bias, w1c, b1, w2c, b2, wmc, bm_p)

    return out[:B, :OUT]


def att_flat_reference(x, x_mask, params):
    """Pure-JAX reference mirroring the PyTorch forward."""
    w1, b1, w2, b2, wm, bm = params
    B, S, H = x.shape
    G = w2.shape[1]
    att = jnp.maximum(x @ w1 + b1, 0.0) @ w2 + b2                   # [B, S, G]
    m = x_mask.reshape(B, S, 1)
    att = jnp.where(m, NEG_INF_FILL, att)
    att = jax.nn.softmax(att, axis=1)
    glimpses = [jnp.sum(att[:, :, i:i + 1] * x, axis=1) for i in range(G)]
    x_atted = jnp.concatenate(glimpses, axis=1)                     # [B, G*H]
    return x_atted @ wm + bm


def init_params(key):
    ks = jax.random.split(key, 6)

    def lin(kw, kb, fan_in, fan_out):
        bound = 1.0 / (fan_in ** 0.5)
        w = jax.random.uniform(kw, (fan_in, fan_out), jnp.float32, -bound, bound)
        b = jax.random.uniform(kb, (1, fan_out), jnp.float32, -bound, bound)
        return w, b

    w1, b1 = lin(ks[0], ks[1], HIDDEN_SIZE, FLAT_MLP_SIZE)
    w2, b2 = lin(ks[2], ks[3], FLAT_MLP_SIZE, FLAT_GLIMPSES)
    wm, bm = lin(ks[4], ks[5], HIDDEN_SIZE * FLAT_GLIMPSES, FLAT_OUT_SIZE)
    return w1, b1, w2, b2, wm, bm


if __name__ == "__main__":
    key = jax.random.PRNGKey(0)
    k_x, k_p, k_x2 = jax.random.split(key, 3)
    params = init_params(k_p)

    # ---- Case 1: B=2, S=8 (multiple of 8), f32 path -> tight tolerance -----
    B, S = 2, 8
    x = jax.random.normal(k_x, (B, S, HIDDEN_SIZE), jnp.float32)
    lengths = jnp.array([6, 8], dtype=jnp.int32)
    x_mask = (jnp.arange(S)[None, :] >= lengths[:, None]).reshape(B, 1, 1, S)

    out = jax.block_until_ready(att_flat(x, x_mask, params))
    ref = att_flat_reference(x, x_mask, params)
    assert out.shape == (B, FLAT_OUT_SIZE)
    assert jnp.allclose(out, ref, atol=1e-5, rtol=1e-5), "f32 mismatch vs reference"

    # ---- Case 2: bf16 streaming of x / matmul weights (v6e/v7x fast path) --
    out_bf16 = jax.block_until_ready(
        att_flat(x, x_mask, params, matmul_dtype=jnp.bfloat16))
    assert jnp.allclose(out_bf16, ref, atol=5e-2, rtol=5e-2), "bf16 mismatch"

    # ---- Case 3: ragged shapes (B=3, S=6) exercise the S/B padding guards --
    B2, S2 = 3, 6
    x2 = jax.random.normal(k_x2, (B2, S2, HIDDEN_SIZE), jnp.float32)
    lengths2 = jnp.array([4, 6, 2], dtype=jnp.int32)
    x_mask2 = (jnp.arange(S2)[None, :] >= lengths2[:, None]).reshape(B2, 1, 1, S2)

    out2 = jax.block_until_ready(att_flat(x2, x_mask2, params))
    ref2 = att_flat_reference(x2, x_mask2, params)
    assert out2.shape == (B2, FLAT_OUT_SIZE)
    assert jnp.allclose(out2, ref2, atol=1e-5, rtol=1e-5), "padded-shape mismatch"

    print("KERNEL_OK")
</pallas_src>

<mosaic_0001>
module attributes {stable_mosaic.version = 11 : i64} {
  func.func @attflat_kernel(%arg0: i32, %arg1: memref<8x8x32xf32, #tpu.memory_space<vmem>>, %arg2: memref<8x8xf32, #tpu.memory_space<vmem>>, %arg3: memref<32x64xf32, #tpu.memory_space<vmem>>, %arg4: memref<1x64xf32, #tpu.memory_space<vmem>>, %arg5: memref<64x2xf32, #tpu.memory_space<vmem>>, %arg6: memref<1x2xf32, #tpu.memory_space<vmem>>, %arg7: memref<64x128xf32, #tpu.memory_space<vmem>>, %arg8: memref<1x128xf32, #tpu.memory_space<vmem>>, %arg9: memref<8x128xf32, #tpu.memory_space<vmem>>) attributes {dimension_semantics = [#tpu.dimension_semantics<parallel>], iteration_bounds = array<i64: 1>, scalar_prefetch = 0 : i64, scratch_operands = 0 : i64, tpu.core_type = #tpu.core_type<tc>, window_params = [{transform_indices = @transform_0, window_bounds = array<i64: 8, 8, 32>}, {transform_indices = @transform_1, window_bounds = array<i64: 8, 8>}, {pipeline_mode = #tpu.pipeline_mode<synchronous>, transform_indices = @transform_2, window_bounds = array<i64: 32, 64>}, {pipeline_mode = #tpu.pipeline_mode<synchronous>, transform_indices = @transform_3, window_bounds = array<i64: 1, 64>}, {pipeline_mode = #tpu.pipeline_mode<synchronous>, transform_indices = @transform_4, window_bounds = array<i64: 64, 2>}, {pipeline_mode = #tpu.pipeline_mode<synchronous>, transform_indices = @transform_5, window_bounds = array<i64: 1, 2>}, {pipeline_mode = #tpu.pipeline_mode<synchronous>, transform_indices = @transform_6, window_bounds = array<i64: 64, 128>}, {pipeline_mode = #tpu.pipeline_mode<synchronous>, transform_indices = @transform_7, window_bounds = array<i64: 1, 128>}, {transform_indices = @transform_8, window_bounds = array<i64: 8, 128>}]} {
    %c0 = arith.constant 0 : index
    %c0_0 = arith.constant 0 : index
    %c0_1 = arith.constant 0 : index
    %0 = vector.load %arg1[%c0, %c0_0, %c0_1] : memref<8x8x32xf32, #tpu.memory_space<vmem>>, vector<8x8x32xf32>
    %c0_2 = arith.constant 0 : index
    %c0_3 = arith.constant 0 : index
    %1 = vector.load %arg2[%c0_2, %c0_3] : memref<8x8xf32, #tpu.memory_space<vmem>>, vector<8x8xf32>
    %2 = vector.shape_cast %0 : vector<8x8x32xf32> to vector<64x32xf32>
    %c0_4 = arith.constant 0 : index
    %c0_5 = arith.constant 0 : index
    %3 = vector.load %arg3[%c0_4, %c0_5] : memref<32x64xf32, #tpu.memory_space<vmem>>, vector<32x64xf32>
    %cst = arith.constant dense<0.000000e+00> : vector<64x64xf32>
    %4 = tpu.matmul %2, %3, %cst {dimension_numbers = #tpu.dot_dimension_numbers<[1], [0], [0], [1], [0, 0, 1, 1], [], []>} : vector<64x32xf32>, vector<32x64xf32>, vector<64x64xf32> -> vector<64x64xf32>
    %c0_6 = arith.constant 0 : index
    %c0_7 = arith.constant 0 : index
    %5 = vector.load %arg4[%c0_6, %c0_7] : memref<1x64xf32, #tpu.memory_space<vmem>>, vector<1x64xf32>
    %6 = vector.broadcast %5 : vector<1x64xf32> to vector<64x64xf32>
    %7 = arith.addf %4, %6 : vector<64x64xf32>
    %cst_8 = arith.constant 0.000000e+00 : f32
    %8 = vector.broadcast %cst_8 : f32 to vector<64x64xf32>
    %9 = arith.maximumf %7, %8 : vector<64x64xf32>
    %c0_9 = arith.constant 0 : index
    %c0_10 = arith.constant 0 : index
    %10 = vector.load %arg5[%c0_9, %c0_10] : memref<64x2xf32, #tpu.memory_space<vmem>>, vector<64x2xf32>
    %cst_11 = arith.constant dense<0.000000e+00> : vector<64x2xf32>
    %11 = tpu.matmul %9, %10, %cst_11 {dimension_numbers = #tpu.dot_dimension_numbers<[1], [0], [0], [1], [0, 0, 1, 1], [], []>} : vector<64x64xf32>, vector<64x2xf32>, vector<64x2xf32> -> vector<64x2xf32>
    %c0_12 = arith.constant 0 : index
    %c0_13 = arith.constant 0 : index
    %12 = vector.load %arg6[%c0_12, %c0_13] : memref<1x2xf32, #tpu.memory_space<vmem>>, vector<1x2xf32>
    %13 = vector.broadcast %12 : vector<1x2xf32> to vector<64x2xf32>
    %14 = arith.addf %11, %13 : vector<64x2xf32>
    %15 = vector.shape_cast %14 : vector<64x2xf32> to vector<8x8x2xf32>
    %16 = vector.shape_cast %1 : vector<8x8xf32> to vector<8x8x1xf32>
    %17 = vector.broadcast %16 : vector<8x8x1xf32> to vector<8x8x2xf32>
    %18 = arith.addf %15, %17 : vector<8x8x2xf32>
    %cst_14 = arith.constant dense<0xFF800000> : vector<8x2xf32>
    %19 = vector.multi_reduction <maximumf>, %18, %cst_14 [1] : vector<8x8x2xf32> to vector<8x2xf32>
    %20 = vector.shape_cast %19 : vector<8x2xf32> to vector<8x1x2xf32>
    %21 = vector.broadcast %20 : vector<8x1x2xf32> to vector<8x8x2xf32>
    %22 = arith.subf %18, %21 : vector<8x8x2xf32>
    %23 = math.exp %22 : vector<8x8x2xf32>
    %cst_15 = arith.constant dense<0.000000e+00> : vector<8x2xf32>
    %24 = vector.multi_reduction <add>, %23, %cst_15 [1] : vector<8x8x2xf32> to vector<8x2xf32>
    %25 = vector.shape_cast %24 : vector<8x2xf32> to vector<8x1x2xf32>
    %26 = vector.broadcast %25 : vector<8x1x2xf32> to vector<8x8x2xf32>
    %27 = arith.divf %23, %26 : vector<8x8x2xf32>
    %28 = vector.extract_strided_slice %27 {offsets = [0, 0, 0], sizes = [8, 8, 1], strides = [1, 1, 1]} : vector<8x8x2xf32> to vector<8x8x1xf32>
    %29 = vector.broadcast %28 : vector<8x8x1xf32> to vector<8x8x32xf32>
    %30 = arith.mulf %29, %0 : vector<8x8x32xf32>
    %cst_16 = arith.constant dense<0.000000e+00> : vector<8x32xf32>
    %31 = vector.multi_reduction <add>, %30, %cst_16 [1] : vector<8x8x32xf32> to vector<8x32xf32>
    %32 = vector.extract_strided_slice %27 {offsets = [0, 0, 1], sizes = [8, 8, 1], strides = [1, 1, 1]} : vector<8x8x2xf32> to vector<8x8x1xf32>
    %33 = vector.broadcast %32 : vector<8x8x1xf32> to vector<8x8x32xf32>
    %34 = arith.mulf %33, %0 : vector<8x8x32xf32>
    %cst_17 = arith.constant dense<0.000000e+00> : vector<8x32xf32>
    %35 = vector.multi_reduction <add>, %34, %cst_17 [1] : vector<8x8x32xf32> to vector<8x32xf32>
    %36 = tpu.concatenate %31, %35 in 1 : vector<8x32xf32>, vector<8x32xf32> -> vector<8x64xf32>
    %c0_18 = arith.constant 0 : index
    %c0_19 = arith.constant 0 : index
    %37 = vector.load %arg7[%c0_18, %c0_19] : memref<64x128xf32, #tpu.memory_space<vmem>>, vector<64x128xf32>
    %cst_20 = arith.constant dense<0.000000e+00> : vector<8x128xf32>
    %38 = tpu.matmul %36, %37, %cst_20 {dimension_numbers = #tpu.dot_dimension_numbers<[1], [0], [0], [1], [0, 0, 1, 1], [], []>} : vector<8x64xf32>, vector<64x128xf32>, vector<8x128xf32> -> vector<8x128xf32>
    %c0_21 = arith.constant 0 : index
    %c0_22 = arith.constant 0 : index
    %39 = vector.load %arg8[%c0_21, %c0_22] : memref<1x128xf32, #tpu.memory_space<vmem>>, vector<1x128xf32>
    %40 = vector.broadcast %39 : vector<1x128xf32> to vector<8x128xf32>
    %41 = arith.addf %38, %40 : vector<8x128xf32>
    %c0_23 = arith.constant 0 : index
    %c0_24 = arith.constant 0 : index
    %42 = vector.load %arg9[%c0_23, %c0_24] : memref<8x128xf32, #tpu.memory_space<vmem>>, vector<8x128xf32>
    tpu.vector_store %arg9[%c0_23, %c0_24], %41 {strides = array<i32>} : memref<8x128xf32, #tpu.memory_space<vmem>>, vector<8x128xf32>,
    return
  }
  func.func @transform_0(%arg0: i32) -> (i32, i32, i32) {
    %c0_i32 = arith.constant 0 : i32
    %c0_i32_0 = arith.constant 0 : i32
    %c0_i32_1 = arith.constant 0 : i32
    return %arg0, %c0_i32, %c0_i32_0 : i32, i32, i32
  }
  func.func @transform_1(%arg0: i32) -> (i32, i32) {
    %c0_i32 = arith.constant 0 : i32
    %c0_i32_0 = arith.constant 0 : i32
    return %arg0, %c0_i32 : i32, i32
  }
  func.func @transform_2(%arg0: i32) -> (i32, i32) {
    %c0_i32 = arith.constant 0 : i32
    %c0_i32_0 = arith.constant 0 : i32
    %c0_i32_1 = arith.constant 0 : i32
    return %c0_i32, %c0_i32_0 : i32, i32
  }
  func.func @transform_3(%arg0: i32) -> (i32, i32) {
    %c0_i32 = arith.constant 0 : i32
    %c0_i32_0 = arith.constant 0 : i32
    %c0_i32_1 = arith.constant 0 : i32
    return %c0_i32, %c0_i32_0 : i32, i32
  }
  func.func @transform_4(%arg0: i32) -> (i32, i32) {
    %c0_i32 = arith.constant 0 : i32
    %c0_i32_0 = arith.constant 0 : i32
    %c0_i32_1 = arith.constant 0 : i32
    return %c0_i32, %c0_i32_0 : i32, i32
  }
  func.func @transform_5(%arg0: i32) -> (i32, i32) {
    %c0_i32 = arith.constant 0 : i32
    %c0_i32_0 = arith.constant 0 : i32
    %c0_i32_1 = arith.constant 0 : i32
    return %c0_i32, %c0_i32_0 : i32, i32
  }
  func.func @transform_6(%arg0: i32) -> (i32, i32) {
    %c0_i32 = arith.constant 0 : i32
    %c0_i32_0 = arith.constant 0 : i32
    %c0_i32_1 = arith.constant 0 : i32
    return %c0_i32, %c0_i32_0 : i32, i32
  }
  func.func @transform_7(%arg0: i32) -> (i32, i32) {
    %c0_i32 = arith.constant 0 : i32
    %c0_i32_0 = arith.constant 0 : i32
    %c0_i32_1 = arith.constant 0 : i32
    return %c0_i32, %c0_i32_0 : i32, i32
  }
  func.func @transform_8(%arg0: i32) -> (i32, i32) {
    %c0_i32 = arith.constant 0 : i32
    %c0_i32_0 = arith.constant 0 : i32
    return %arg0, %c0_i32 : i32, i32
  }
}

</mosaic_0001>

<bundles_post_ra>
// kernel: tpu_custom_call.1
= control target key start
LH: loop header
LB: loop body
LE: loop exit
PB: predicated region body
PF: predicated region fallthrough
CT: control target
= control target key end

     0   :  { %13 = vsyncpa [#allocation3], 0  ;;  %s1483_s0 = inlined_call_operand.vmem [shape: f32[8,8,32], index: 0, kind: input, shape index: {}]   ;;  %s1484_s1 = inlined_call_operand.hbm [shape: f32[8,8], index: 1, kind: input, shape index: {}]   ;;  %s1485_s2 = inlined_call_operand.hbm [shape: f32[32,64], index: 2, kind: input, shape index: {}]   ;;  %s1486_s3 = inlined_call_operand.vmem [shape: f32[1,64], index: 3, kind: input, shape index: {}]   ;;  %s1487_s4 = inlined_call_operand.vmem [shape: f32[64,2], index: 4, kind: input, shape index: {}]   ;;  %s1488_s5 = inlined_call_operand.vmem [shape: f32[1,2], index: 5, kind: input, shape index: {}]   ;;  %s1489_s6 = inlined_call_operand.hbm [shape: f32[64,128], index: 6, kind: input, shape index: {}]   ;;  %s1490_s7 = inlined_call_operand.vmem [shape: f32[1,128], index: 7, kind: input, shape index: {}]   ;;  %s1491_s8 = inlined_call_operand.hbm [shape: f32[8,128], index: 8, kind: output, shape index: {}]  }
   0x1   :  { %14 = vsyncpa [#allocation6], 0 }
   0x2   :  { %15 = vsyncpa [#allocation4], 0  ;;  %s1194_s27 = smov [#allocation5]  }
   0x3   :  { %s33_s28 = sshll.u32 %s1194_s27, 4  ;;  %s34_s28 = int_to_ptr.vmem [resolvable:$true] %s33_s28 }
   0x4   :  { %s1116_s29 = scalar_lea.vmem %s34_s28, 512  ;;  %p1121_p1 = scmp.lt.s32.totalorder %s34_s28, %s34_s28 }
   0x5   :  { %p1117_p0 = scmp.ne.s32.totalorder %s34_s28, %s1116_s29  ;;  %p1122_p2 = scmp.lt.s32.totalorder %s1116_s29, %s1116_s29 }
   0x7   :  { %p1123_p3 = por %p1122_p2, %p1121_p1 }
   0x9   :  { %p1124_p4 = pnand %p1123_p3, %p1117_p0 }
   0xb   :  { %1127 = shalt.err (!%p1124_p4)
}
   0xc   :  { %s1195_s30 = smov 128   ;;  %s1196_s9 = smov 8  }
   0xd   :  { %39 = dma.hbm_to_vmem [thread:$0]  %s1485_s2, 512, %s34_s28, [#allocation6], %s1195_s30, %s1195_s30, %s1196_s9  }
   0xe   :  { %s1197_s12 = smov [#allocation2]   ;;  %s1198_s14 = smov [#allocation7]  }
   0xf   :  { %s24_s13 = sshll.u32 %s1197_s12, 4  ;;  %s51_s15 = sshll.u32 %s1198_s14, 4  ;;  %s25_s13 = int_to_ptr.vmem [resolvable:$true] %s24_s13  ;;  %s52_s15 = int_to_ptr.vmem [resolvable:$true] %s51_s15 }
  0x10   :  { %s1136_s16 = scalar_lea.vmem %s25_s13, 128  ;;  %p1141_p6 = scmp.lt.s32.totalorder %s25_s13, %s25_s13 }
  0x11   :  { %p1137_p5 = scmp.ne.s32.totalorder %s25_s13, %s1136_s16  ;;  %p1142_p7 = scmp.lt.s32.totalorder %s1136_s16, %s1136_s16 }
  0x13   :  { %p1143_p8 = por %p1142_p7, %p1141_p6 }
  0x15   :  { %p1144_p9 = pnand %p1143_p8, %p1137_p5 }
  0x17   :  { %1147 = shalt.err (!%p1144_p9)
}
  0x18   :  { %27 = dma.hbm_to_vmem [thread:$0]  %s1484_s1, 128, %s25_s13, [#allocation3]  }
  0x19   :  { %s1156_s19 = scalar_lea.vmem %s52_s15, 1024  ;;  %p1161_p11 = scmp.lt.s32.totalorder %s52_s15, %s52_s15 }
  0x1a   :  { %p1157_p10 = scmp.ne.s32.totalorder %s52_s15, %s1156_s19  ;;  %p1162_p12 = scmp.lt.s32.totalorder %s1156_s19, %s1156_s19 }
  0x1c   :  { %p1163_p13 = por %p1162_p12, %p1161_p11 }
  0x1e   :  { %p1164_p0 = pnand %p1163_p13, %p1157_p10 }
  0x20   :  { %1167 = shalt.err (!%p1164_p0)
}
  0x21   :  { %57 = dma.hbm_to_vmem [thread:$0]  %s1489_s6, 1024, %s52_s15, [#allocation6], %s1195_s30, %s1195_s30, %s1196_s9  }
  0x22   :  { %1188 = dma.done.wait [#allocation3], 128  }
  0x23   :  { %1189 = vsyncadd [#allocation3], 4294967168 }
  0x24   :  { %1190 = dma.done.wait [#allocation6], 1536  }
  0x25   :  { %1191 = vsyncadd [#allocation6], 4294965760  ;;  %vm89_vm0 = vcmask 261120   ;;  %v81_v0 = vld [vmem:[#allocation5 + $0x18] sm:$0xff]  ;;  %v80_v1 = vld [vmem:[#allocation5 + $0x10] sm:$0xff]  ;;  %v372_v20 = vlaneseq  ;;  %vm242_vm1 = vcmask 523264  }
  0x26   :  { %993 = vmatprep.subr.mxu0 %v81_v0  ;;  %v1262_v2 = vld [vmem:[%s1483_s0] sm:$0xff]  ;;  %v79_v3 = vld [vmem:[#allocation5 + $0x8] sm:$0xff]  ;;  %v78_v4 = vld [vmem:[#allocation5] sm:$0xff]  ;;  %vm436_vm2 = vcmask 15360   ;;  %vm797_vm3 = vcmask 1041409   ;;  %vm799_vm4 = vcmask 1042434  }
  0x27   :  { %994 = vmatpush3.msra.mxu0 %v81_v0  ;;  %1001 = vmatprep.mubr.msk.f32.mxu0 %vm89_vm0, %v1262_v2  ;;  %v234_v5 = vld [vmem:[%s1487_s4 + $0x38] sm:$0xff]  ;;  %v233_v6 = vld [vmem:[%s1487_s4 + $0x30] sm:$0xff]  ;;  %v1275_v7 = vld [vmem:[%s1483_s0 + $0x8] sm:$0xff]  ;;  %v373_v21 = vshrl.u32 %v372_v20, 7  ;;  %v1199_v0 = vmov 1   ;;  %vm801_vm5 = vcmask 1043459  }
  0x28   :  { %995 = vmatprep.subr.mxu0 %v80_v1  ;;  %1013 = vmatprep.subr.mxu1 %v234_v5  ;;  %v232_v8 = vld [vmem:[%s1487_s4 + $0x28] sm:$0xff]  ;;  %v1283_v9 = vld [vmem:[%s1483_s0 + $0x10] sm:$0xff]  ;;  %v231_v10 = vld [vmem:[%s1487_s4 + $0x20] sm:$0xff]  ;;  %vm803_vm6 = vcmask 1044484   ;;  %vm805_vm7 = vcmask 1045509   ;;  %vm807_vm8 = vcmask 1046534  }
  0x29   :  { %996 = vmatpush3.msra.mxu0 %v80_v1  ;;  %1014 = vmatpush3.msra.mxu1 %v234_v5  ;;  %v1295_v11 = vld [vmem:[%s1483_s0 + $0x18] sm:$0xff]  ;;  %v1300_v12 = vld [vmem:[%s1483_s0 + $0x20] sm:$0xff]  ;;  %v1309_v13 = vld [vmem:[%s1483_s0 + $0x28] sm:$0xff]  ;;  %v374_v23 = vsub.s32 0, %v373_v21  ;;  %v388_v24 = vsub.s32 2, %v373_v21  ;;  %v381_v25 = vsub.s32 1, %v373_v21 }
  0x2a   :  { %997 = vmatprep.subr.mxu0 %v79_v3  ;;  %1015 = vmatprep.subr.mxu1 %v233_v6  ;;  %v1314_v14 = vld [vmem:[%s1483_s0 + $0x30] sm:$0xff]  ;;  %v1323_v15 = vld [vmem:[%s1483_s0 + $0x38] sm:$0xff]  ;;  %v228_v18 = vld [vmem:[%s1487_s4 + $0x8] sm:$0xff]  ;;  %v395_v26 = vsub.s32 3, %v373_v21  ;;  %v409_v31 = vsub.s32 5, %v373_v21  ;;  %v402_v32 = vsub.s32 4, %v373_v21 }
  0x2b   :  { %998 = vmatpush3.msra.mxu0 %v79_v3  ;;  %1016 = vmatpush3.msra.mxu1 %v233_v6  ;;  %v230_v16 = vld [vmem:[%s1487_s4 + $0x18] sm:$0xff]  ;;  %v229_v17 = vld [vmem:[%s1487_s4 + $0x10] sm:$0xff]  ;;  %v227_v19 = vld [vmem:[%s1487_s4] sm:$0xff]  ;;  %v423_v35 = vsub.s32 7, %v373_v21  ;;  %v416_v36 = vsub.s32 6, %v373_v21  ;;  %vm809_vm9 = vcmask 1047559  }
  0x2c   :  { %999 = vmatprep.subr.mxu0 %v78_v4  ;;  %1017 = vmatprep.subr.mxu1 %v232_v8  ;;  %v77_v22 = vld [vmem:[#allocation2] sm:$0xff]  ;;  %vm1202_vm10 = vmmov 0   ;;  %s1204_s29 = smov [#allocation8]  }
  0x2d   :  { %1000 = vmatpush3.msra.mxu0 %v78_v4  ;;  %1018 = vmatpush3.msra.mxu1 %v232_v8  ;;  %v375_v27 = vrot.slane %v77_v22, %v374_v23  ;;  %v389_v28 = vrot.slane %v77_v22, %v388_v24  ;;  %v382_v29 = vrot.slane %v77_v22, %v381_v25  ;;  %v936_v39 = vld [vmem:[%s1486_s3] ss:$0 sm:$0xff]  ;;  %s926_s30 = sshll.u32 %s1204_s29, 4  ;;  %s927_s30 = int_to_ptr.vmem [resolvable:$true] %s926_s30 }
  0x2e   :  { %1002 = vmatmul.mubr.msk.f32.vlgmr.msra.gmra.mxu0 %vm89_vm0, %v1275_v7  ;;  %1019 = vmatprep.subr.mxu1 %v231_v10  ;;  %v396_v30 = vrot.slane %v77_v22, %v395_v26  ;;  %v410_v33 = vrot.slane %v77_v22, %v409_v31  ;;  %v403_v34 = vrot.slane %v77_v22, %v402_v32  ;;  %v945_v4 = vld [vmem:[%s1488_s5] ss:$0 sm:$0xff]  ;;  %s1203_s5 = smov 32   ;;  %s1168_s9 = scalar_lea.vmem %s927_s30, 128 }
  0x2f   :  { %1004 = vmatprep.mubr.msk.f32.mxu0 %vm89_vm0, %v1283_v9  ;;  %1020 = vmatpush3.msra.mxu1 %v231_v10  ;;  %v424_v37 = vrot.slane %v77_v22, %v423_v35  ;;  %v417_v38 = vrot.slane %v77_v22, %v416_v36  ;;  %p1169_p1 = scmp.ne.s32.totalorder %s927_s30, %s1168_s9  ;;  %p1173_p2 = scmp.lt.s32.totalorder %s927_s30, %s927_s30 }
  0x30   :  { %1021 = vmatprep.subr.mxu1 %v230_v16  ;;  %377 = vbcast.lane.b32.xlu0 %v375_v27, 256  ;;  %p1174_p3 = scmp.lt.s32.totalorder %s1168_s9, %s1168_s9 }
  0x31   :  { %1022 = vmatpush3.msra.mxu1 %v230_v16  ;;  %391 = vbcast.lane.b32.xlu1 %v389_v28, 256 }
  0x32   :  { %1005 = vmatmul.mubr.msk.f32.gmra.mxu0 %vm89_vm0, %v1295_v11  ;;  %1023 = vmatprep.subr.mxu1 %v229_v17  ;;  %p1175_p4 = por %p1174_p3, %p1173_p2 }
  0x33   :  { %1007 = vmatprep.mubr.msk.f32.mxu0 %vm89_vm0, %v1300_v12  ;;  %1024 = vmatpush3.msra.mxu1 %v229_v17 }
  0x34   :  { %1025 = vmatprep.subr.mxu1 %v228_v18  ;;  %384 = vbcast.lane.b32.xlu0 %v382_v29, 256  ;;  %p1176_p5 = pnand %p1175_p4, %p1169_p1 }
  0x35   :  { %1026 = vmatpush3.msra.mxu1 %v228_v18  ;;  %398 = vbcast.lane.b32.xlu1 %v396_v30, 256 }
  0x36   :  { %1008 = vmatmul.mubr.msk.f32.gmra.mxu0 %vm89_vm0, %v1309_v13  ;;  %1027 = vmatprep.subr.mxu1 %v227_v19 }
  0x37   :  { %1010 = vmatprep.mubr.msk.f32.mxu0 %vm89_vm0, %v1314_v14  ;;  %1028 = vmatpush3.msra.mxu1 %v227_v19 }
  0x38   :  { %405 = vbcast.lane.b32.xlu0 %v403_v34, 256  ;;  %1071 = vset.pattern.permute.xlu1 %v1199_v0 }
  0x39   :  { %412 = vbcast.lane.b32.xlu1 %v410_v33, 256  ;;  %1072 = vset.pattern.permute.xlu0 %v1199_v0 }
  0x3a   :  { %1011 = vmatmul.mubr.msk.f32.gmra.mxu0 %vm89_vm0, %v1323_v15 }
  0x3c   :  { %419 = vbcast.lane.b32.xlu0 %v417_v38, 256 }
  0x3d   :  { %426 = vbcast.lane.b32.xlu1 %v424_v37, 256 }
  0xa2   :  { %v378_v1 = vpop.permute.xlu0 %377 }
  0xa3   :  { %v392_v3 = vpop.permute.xlu1 %391 }
  0xa6   :  { %v385_v5 = vpop.permute.xlu0 %384 }
  0xa7   :  { %v399_v8 = vpop.permute.xlu1 %398 }
  0xaa   :  { %v406_v32 = vpop.permute.xlu0 %405 }
  0xab   :  { %v413_v25 = vpop.permute.xlu1 %412 }
  0xee   :  { %v1003_v40 = vpop.f32.mrf.mxu0 }
  0xef   :  { %v186_v41 = vadd.f32 %v1003_v40, %v936_v39 }
  0xf0   :  { %v180_v42 = vpop.f32.mrf.mxu0 }
  0xf1   :  { %v181_v43 = vadd.f32 %v936_v39, %v180_v42  ;;  %v220_v46 = vmax.f32 %v186_v41, 0.0 }
  0xf2   :  { %v1006_v44 = vpop.f32.mrf.mxu0 }
  0xf3   :  { %v219_v45 = vmax.f32 %v181_v43, 0.0  ;;  %v196_v47 = vadd.f32 %v1006_v44, %v936_v39 }
  0xf4   :  { %v190_v48 = vpop.f32.mrf.mxu0 }
  0xf5   :  { %v191_v49 = vadd.f32 %v936_v39, %v190_v48  ;;  %1029 = vmatprep.mubr.msk.f32.mxu1 %vm242_vm1, %v219_v45  ;;  %v222_v52 = vmax.f32 %v196_v47, 0.0  ;;  %v427_v48 = vpop.permute.xlu1 %426 }
  0xf6   :  { %v1009_v50 = vpop.f32.mrf.mxu0  ;;  %1030 = vmatmul.mubr.msk.f32.vlgmr.msra.gmra.mxu1 %vm242_vm1, %v220_v46 }
  0xf7   :  { %v221_v51 = vmax.f32 %v191_v49, 0.0  ;;  %v206_v53 = vadd.f32 %v1009_v50, %v936_v39 }
  0xf8   :  { %v200_v54 = vpop.f32.mrf.mxu0 }
  0xf9   :  { %v201_v55 = vadd.f32 %v936_v39, %v200_v54  ;;  %1032 = vmatprep.mubr.msk.f32.mxu1 %vm242_vm1, %v221_v51  ;;  %v224_v58 = vmax.f32 %v206_v53, 0.0 }
  0xfa   :  { %v1012_v56 = vpop.f32.mrf.mxu0  ;;  %1033 = vmatmul.mubr.msk.f32.gmra.mxu1 %vm242_vm1, %v222_v52 }
  0xfb   :  { %v223_v57 = vmax.f32 %v201_v55, 0.0  ;;  %v216_v59 = vadd.f32 %v1012_v56, %v936_v39 }
  0xfc   :  { %v210_v60 = vpop.f32.mrf.mxu0 }
  0xfd   :  { %v211_v61 = vadd.f32 %v936_v39, %v210_v60  ;;  %1035 = vmatprep.mubr.msk.f32.mxu1 %vm242_vm1, %v223_v57  ;;  %v226_v63 = vmax.f32 %v216_v59, 0.0  ;;  %v420_v57 = vpop.permute.xlu0 %419 }
  0xfe   :  { %1036 = vmatmul.mubr.msk.f32.gmra.mxu1 %vm242_vm1, %v224_v58 }
  0xff   :  { %v225_v62 = vmax.f32 %v211_v61, 0.0 }
 0x101   :  { %1038 = vmatprep.mubr.msk.f32.mxu1 %vm242_vm1, %v225_v62 }
 0x102   :  { %1039 = vmatmul.mubr.msk.f32.gmra.mxu1 %vm242_vm1, %v226_v63 }
 0x1b6   :  { %v1031_v6 = vpop.f32.mrf.mxu1 }
 0x1b7   :  { %v339_v10 = vadd.f32 %v1031_v6, %v945_v4 }
 0x1b8   :  { %v333_v16 = vpop.f32.mrf.mxu1 }
 0x1b9   :  { %v429_v17 = vadd.f32 %v385_v5, %v339_v10  ;;  %v334_v18 = vadd.f32 %v945_v4, %v333_v16 }
 0x1ba   :  { %v1034_v19 = vpop.f32.mrf.mxu1 }
 0x1bb   :  { %v444_v20 = vsel %vm436_vm2, %v429_v17, -inf  ;;  %v1356_v21 = vadd.f32 %v378_v1, %v334_v18  ;;  %v349_v22 = vadd.f32 %v1034_v19, %v945_v4 }
 0x1bc   :  { %v445_v23 = vrot.slane %v444_v20, 4  ;;  %v343_v24 = vpop.f32.mrf.mxu1 }
 0x1bd   :  { %v437_v26 = vsel %vm436_vm2, %v1356_v21, -inf  ;;  %v1360_v27 = vadd.f32 %v399_v8, %v349_v22  ;;  %v344_v28 = vadd.f32 %v945_v4, %v343_v24 }
 0x1be   :  { %v446_v29 = vmax.f32 %v444_v20, %v445_v23  ;;  %v438_v30 = vrot.slane %v437_v26, 4  ;;  %v1037_v31 = vpop.f32.mrf.mxu1 }
 0x1bf   :  { %v458_v33 = vsel %vm436_vm2, %v1360_v27, -inf  ;;  %v1364_v34 = vadd.f32 %v392_v3, %v344_v28  ;;  %v359_v35 = vadd.f32 %v1037_v31, %v945_v4 }
 0x1c0   :  { %v447_v36 = vrot.slane %v446_v29, 2  ;;  %v439_v37 = vmax.f32 %v437_v26, %v438_v30  ;;  %v459_v38 = vrot.slane %v458_v33, 4  ;;  %v353_v39 = vpop.f32.mrf.mxu1 }
 0x1c1   :  { %v451_v40 = vsel %vm436_vm2, %v1364_v34, -inf  ;;  %v1368_v41 = vadd.f32 %v413_v25, %v359_v35  ;;  %v354_v42 = vadd.f32 %v945_v4, %v353_v39 }
 0x1c2   :  { %v448_v43 = vmax.f32 %v446_v29, %v447_v36  ;;  %v440_v44 = vrot.slane %v439_v37, 2  ;;  %v460_v45 = vmax.f32 %v458_v33, %v459_v38  ;;  %v452_v46 = vrot.slane %v451_v40, 4  ;;  %v1040_v47 = vpop.f32.mrf.mxu1 }
 0x1c3   :  { %v472_v49 = vsel %vm436_vm2, %v1368_v41, -inf  ;;  %v1372_v50 = vadd.f32 %v406_v32, %v354_v42  ;;  %v369_v51 = vadd.f32 %v1040_v47, %v945_v4 }
 0x1c4   :  { %v449_v52 = vrot.slane %v448_v43, 1  ;;  %v441_v53 = vmax.f32 %v439_v37, %v440_v44  ;;  %v461_v54 = vrot.slane %v460_v45, 2  ;;  %v453_v55 = vmax.f32 %v451_v40, %v452_v46  ;;  %v363_v56 = vpop.f32.mrf.mxu1 }
 0x1c5   :  { %v473_v58 = vrot.slane %v472_v49, 4  ;;  %v465_v59 = vsel %vm436_vm2, %v1372_v50, -inf  ;;  %v435_v60 = vadd.f32 %v427_v48, %v369_v51  ;;  %v364_v61 = vadd.f32 %v945_v4, %v363_v56 }
 0x1c6   :  { %v450_v62 = vmax.f32 %v448_v43, %v449_v52  ;;  %v442_v63 = vrot.slane %v441_v53, 1  ;;  %v462_v1 = vmax.f32 %v460_v45, %v461_v54  ;;  %v454_v3 = vrot.slane %v453_v55, 2 }
 0x1c7   :  { %v474_v5 = vmax.f32 %v472_v49, %v473_v58  ;;  %v466_v6 = vrot.slane %v465_v59, 4  ;;  %v486_v8 = vsel %vm436_vm2, %v435_v60, -inf  ;;  %v434_v10 = vadd.f32 %v420_v57, %v364_v61 }
 0x1c8   :  { %v494_v16 = vsub.f32 %v429_v17, %v450_v62  ;;  %v443_v18 = vmax.f32 %v441_v53, %v442_v63  ;;  %v463_v19 = vrot.slane %v462_v1, 1  ;;  %v455_v20 = vmax.f32 %v453_v55, %v454_v3 }
 0x1c9   :  { %v475_v22 = vrot.slane %v474_v5, 2  ;;  %v467_v23 = vmax.f32 %v465_v59, %v466_v6  ;;  %v487_v24 = vrot.slane %v486_v8, 4  ;;  %v479_v25 = vsel %vm436_vm2, %v434_v10, -inf }
 0x1ca   :  { %v503_v26 = vmul.f32 1.442695, %v494_v16  ;;  %v493_v4 = vsub.f32 %v1356_v21, %v443_v18  ;;  %v464_v28 = vmax.f32 %v462_v1, %v463_v19  ;;  %v456_v29 = vrot.slane %v455_v20, 1 }
 0x1cb   :  { %v476_v30 = vmax.f32 %v474_v5, %v475_v22  ;;  %v468_v31 = vrot.slane %v467_v23, 2  ;;  %v488_v32 = vmax.f32 %v486_v8, %v487_v24  ;;  %v480_v33 = vrot.slane %v479_v25, 4 }
 0x1cc   :  { %1076 = vpow2.f32 %v503_v26  ;;  %v501_v35 = vmul.f32 1.442695, %v493_v4  ;;  %v496_v17 = vsub.f32 %v1360_v27, %v464_v28  ;;  %v457_v36 = vmax.f32 %v455_v20, %v456_v29 }
 0x1cd   :  { %v477_v37 = vrot.slane %v476_v30, 1  ;;  %v469_v38 = vmax.f32 %v467_v23, %v468_v31  ;;  %v489_v39 = vrot.slane %v488_v32, 2  ;;  %v481_v40 = vmax.f32 %v479_v25, %v480_v33 }
 0x1ce   :  { %1078 = vpow2.f32 %v501_v35  ;;  %v507_v42 = vmul.f32 1.442695, %v496_v17  ;;  %v495_v43 = vsub.f32 %v1364_v34, %v457_v36 }
 0x1cf   :  { %v478_v21 = vmax.f32 %v476_v30, %v477_v37  ;;  %v470_v44 = vrot.slane %v469_v38, 1  ;;  %v490_v45 = vmax.f32 %v488_v32, %v489_v39  ;;  %v482_v46 = vrot.slane %v481_v40, 2 }
 0x1d0   :  { %1080 = vpow2.f32 %v507_v42  ;;  %v505_v47 = vmul.f32 1.442695, %v495_v43 }
 0x1d1   :  { %v498_v48 = vsub.f32 %v1368_v41, %v478_v21  ;;  %v471_v49 = vmax.f32 %v469_v38, %v470_v44  ;;  %v491_v51 = vrot.slane %v490_v45, 1  ;;  %v483_v27 = vmax.f32 %v481_v40, %v482_v46 }
 0x1d2   :  { %1082 = vpow2.f32 %v505_v47 }
 0x1d3   :  { %v511_v52 = vmul.f32 1.442695, %v498_v48  ;;  %v497_v53 = vsub.f32 %v1372_v50, %v471_v49  ;;  %v492_v54 = vmax.f32 %v490_v45, %v491_v51  ;;  %v484_v55 = vrot.slane %v483_v27, 1 }
 0x1d5   :  { %1084 = vpow2.f32 %v511_v52  ;;  %v509_v56 = vmul.f32 1.442695, %v497_v53  ;;  %v500_v34 = vsub.f32 %v435_v60, %v492_v54  ;;  %v485_v57 = vmax.f32 %v483_v27, %v484_v55 }
 0x1d7   :  { %1086 = vpow2.f32 %v509_v56  ;;  %v515_v58 = vmul.f32 1.442695, %v500_v34  ;;  %v499_v59 = vsub.f32 %v434_v10, %v485_v57 }
 0x1d9   :  { %v1383_v61 = vpop.eup %1076  ;;  %1088 = vpow2.f32 %v515_v58  ;;  %v513_v41 = vmul.f32 1.442695, %v499_v59 }
 0x1da   :  { %v524_v62 = vsel %vm436_vm2, %v1383_v61, 0.0 }
 0x1db   :  { %v1387_v63 = vpop.eup %1078  ;;  %v525_v1 = vrot.slane %v524_v62, 4  ;;  %1090 = vpow2.f32 %v513_v41 }
 0x1dc   :  { %v517_v50 = vsel %vm436_vm2, %v1387_v63, 0.0 }
 0x1dd   :  { %v1391_v3 = vpop.eup %1080  ;;  %v526_v60 = vadd.f32 %v525_v1, %v524_v62  ;;  %v518_v5 = vrot.slane %v517_v50, 4 }
 0x1de   :  { %v538_v6 = vsel %vm436_vm2, %v1391_v3, 0.0 }
 0x1df   :  { %v1395_v8 = vpop.eup %1082  ;;  %v527_v10 = vrot.slane %v526_v60, 2  ;;  %v519_v16 = vadd.f32 %v518_v5, %v517_v50  ;;  %v539_v18 = vrot.slane %v538_v6, 4 }
 0x1e0   :  { %v531_v19 = vsel %vm436_vm2, %v1395_v8, 0.0 }
 0x1e1   :  { %v540_v20 = vadd.f32 %v539_v18, %v538_v6  ;;  %v532_v22 = vrot.slane %v531_v19, 4  ;;  %v528_v23 = vadd.f32 %v527_v10, %v526_v60  ;;  %v520_v24 = vrot.slane %v519_v16, 2 }
 0x1e2   :  { %v1399_v25 = vpop.eup %1084 }
 0x1e3   :  { %v541_v26 = vrot.slane %v540_v20, 2  ;;  %v533_v4 = vadd.f32 %v532_v22, %v531_v19  ;;  %v552_v28 = vsel %vm436_vm2, %v1399_v25, 0.0  ;;  %v529_v29 = vrot.slane %v528_v23, 1 }
 0x1e4   :  { %v1403_v30 = vpop.eup %1086  ;;  %v553_v31 = vrot.slane %v552_v28, 4  ;;  %v521_v32 = vadd.f32 %v520_v24, %v519_v16 }
 0x1e5   :  { %v545_v33 = vsel %vm436_vm2, %v1403_v30, 0.0  ;;  %v530_v35 = vadd.f32 %v529_v29, %v528_v23  ;;  %v534_v17 = vrot.slane %v533_v4, 2  ;;  %v542_v36 = vadd.f32 %v541_v26, %v540_v20 }
 0x1e6   :  { %v1407_v37 = vpop.eup %1088  ;;  %v554_v38 = vadd.f32 %v553_v31, %v552_v28  ;;  %v546_v39 = vrot.slane %v545_v33, 4  ;;  %v522_v40 = vrot.slane %v521_v32, 1 }
 0x1e7   :  { %v566_v42 = vsel %vm436_vm2, %v1407_v37, 0.0  ;;  %1092 = vrcp.f32 %v530_v35  ;;  %v535_v43 = vadd.f32 %v534_v17, %v533_v4  ;;  %v543_v21 = vrot.slane %v542_v36, 1 }
 0x1e8   :  { %v1091_v44 = vpop.eup %1090  ;;  %v555_v45 = vrot.slane %v554_v38, 2  ;;  %v547_v46 = vadd.f32 %v546_v39, %v545_v33  ;;  %v567_v47 = vrot.slane %v566_v42, 4  ;;  %v523_v48 = vadd.f32 %v522_v40, %v521_v32  ;;  %v832_v39 = vld [vmem:[#allocation7 + $0x8] sm:$0xff]  ;;  %v831_v40 = vld [vmem:[#allocation7] sm:$0xff] }
 0x1e9   :  { %v559_v49 = vsel %vm436_vm2, %v1091_v44, 0.0  ;;  %v536_v51 = vrot.slane %v535_v43, 1  ;;  %v544_v27 = vadd.f32 %v543_v21, %v542_v36  ;;  %v836_v36 = vld [vmem:[#allocation7 + $0x28] sm:$0xff] }
 0x1ea   :  { %v548_v52 = vrot.slane %v547_v46, 2  ;;  %v568_v53 = vadd.f32 %v567_v47, %v566_v42  ;;  %v560_v54 = vrot.slane %v559_v49, 4  ;;  %1094 = vrcp.f32 %v523_v48 }
 0x1eb   :  { %v537_v55 = vadd.f32 %v536_v51, %v535_v43  ;;  %v556_v56 = vadd.f32 %v555_v45, %v554_v38  ;;  %1096 = vrcp.f32 %v544_v27  ;;  %v834_v38 = vld [vmem:[#allocation7 + $0x18] sm:$0xff] }
 0x1ec   :  { %v569_v34 = vrot.slane %v568_v53, 2  ;;  %v561_v57 = vadd.f32 %v560_v54, %v559_v49  ;;  %v549_v58 = vadd.f32 %v548_v52, %v547_v46 }
 0x1ed   :  { %1098 = vrcp.f32 %v537_v55  ;;  %v557_v59 = vrot.slane %v556_v56, 1 }
 0x1ee   :  { %v562_v41 = vrot.slane %v561_v57, 2  ;;  %v550_v62 = vrot.slane %v549_v58, 1  ;;  %v570_v1 = vadd.f32 %v569_v34, %v568_v53 }
 0x1ef   :  { %v558_v50 = vadd.f32 %v557_v59, %v556_v56 }
 0x1f0   :  { %v551_v60 = vadd.f32 %v550_v62, %v549_v58  ;;  %v563_v5 = vadd.f32 %v562_v41, %v561_v57  ;;  %v571_v6 = vrot.slane %v570_v1, 1 }
 0x1f1   :  { %1100 = vrcp.f32 %v558_v50 }
 0x1f2   :  { %1102 = vrcp.f32 %v551_v60  ;;  %v564_v10 = vrot.slane %v563_v5, 1  ;;  %v572_v16 = vadd.f32 %v571_v6, %v570_v1 }
 0x1f4   :  { %v1093_v18 = vpop.eup %1092  ;;  %v565_v19 = vadd.f32 %v564_v10, %v563_v5  ;;  %1104 = vrcp.f32 %v572_v16 }
 0x1f5   :  { %v576_v20 = vmul.f32 %v1093_v18, %v1383_v61 }
 0x1f6   :  { %1106 = vrcp.f32 %v565_v19 }
 0x1f7   :  { %v1095_v22 = vpop.eup %1094  ;;  %698 = vperm.xlu1 %1071, %v576_v20  }
 0x1f8   :  { %v574_v23 = vmul.f32 %v1095_v22, %v1387_v63  ;;  %v1097_v24 = vpop.eup %1096 }
 0x1f9   :  { %v580_v28 = vmul.f32 %v1097_v24, %v1391_v3  ;;  %v838_v3 = vld [vmem:[#allocation7 + $0x38] sm:$0xff] }
 0x1fa   :  { %v1099_v26 = vpop.eup %1098  ;;  %694 = vperm.xlu0 %1072, %v574_v23  }
 0x1fb   :  { %v578_v4 = vmul.f32 %v1099_v26, %v1395_v8  ;;  %v1200_v8 = vmov 0  }
 0x1fd   :  { %702 = vperm.xlu1 %1071, %v578_v4  }
 0x1fe   :  { %v1101_v29 = vpop.eup %1100  ;;  %706 = vperm.xlu0 %1072, %v580_v28  }
 0x1ff   :  { %v1103_v31 = vpop.eup %1102  ;;  %v584_v61 = vmul.f32 %v1101_v29, %v1399_v25  ;;  %v1201_v25 = vmov 0.0  }
 0x200   :  { %v582_v32 = vmul.f32 %v1103_v31, %v1403_v30  ;;  %1041 = vmatprep.subr.mxu0 %v1201_v25  ;;  %v837_v30 = vld [vmem:[#allocation7 + $0x30] sm:$0xff]  ;;  %1057 = vmatprep.mubr.msk.f32.mxu0 %vm1202_vm10, %v1201_v25 }
 0x201   :  { %v1105_v33 = vpop.eup %1104  ;;  %1042 = vmatpush3.msra.mxu0 %v838_v3 }
 0x202   :  { %710 = vperm.xlu1 %1071, %v582_v32   ;;  %714 = vperm.xlu0 %1072, %v584_v61   ;;  %v588_v17 = vmul.f32 %v1105_v33, %v1407_v37  ;;  %v835_v37 = vld [vmem:[#allocation7 + $0x20] sm:$0xff] }
 0x203   :  { %v1107_v35 = vpop.eup %1106  ;;  %1043 = vmatprep.subr.mxu0 %v1201_v25 }
 0x204   :  { %v586_v63 = vmul.f32 %v1107_v35, %v1091_v44  ;;  %1044 = vmatpush3.msra.mxu0 %v837_v30 }
 0x205   :  { %1045 = vmatprep.subr.mxu0 %v1201_v25 }
 0x206   :  { %718 = vperm.xlu1 %1071, %v586_v63   ;;  %722 = vperm.xlu0 %1072, %v588_v17  }
 0x207   :  { %1046 = vmatpush3.msra.mxu0 %v836_v36 }
 0x208   :  { %1047 = vmatprep.subr.mxu0 %v1201_v25 }
 0x209   :  { %1048 = vmatpush3.msra.mxu0 %v835_v37 }
 0x20a   :  { %1073 = vset.pattern.permute.xlu1 %v1200_v8  ;;  %1074 = vset.pattern.permute.xlu0 %v1200_v8 }
 0x20b   :  { %591 = vperm.xlu1 %1073, %v574_v23   ;;  %596 = vperm.xlu0 %1074, %v576_v20  }
 0x20c   :  { %1049 = vmatprep.subr.mxu0 %v1201_v25 }
 0x20d   :  { %1050 = vmatpush3.msra.mxu0 %v834_v38 }
 0x20e   :  { %1051 = vmatprep.subr.mxu0 %v1201_v25 }
 0x20f   :  { %601 = vperm.xlu1 %1073, %v578_v4   ;;  %611 = vperm.xlu0 %1074, %v582_v32  }
 0x213   :  { %606 = vperm.xlu1 %1073, %v580_v28   ;;  %621 = vperm.xlu0 %1074, %v586_v63  }
 0x217   :  { %616 = vperm.xlu1 %1073, %v584_v61   ;;  %1075 = vset.pattern.permute.xlu0 %v1199_v0  ;;  %v833_v0 = vld [vmem:[#allocation7 + $0x10] sm:$0xff] }
 0x218   :  { %1052 = vmatpush3.msra.mxu0 %v833_v0 }
 0x219   :  { %1053 = vmatprep.subr.mxu0 %v1201_v25 }
 0x21a   :  { %1054 = vmatpush3.msra.mxu0 %v832_v39 }
 0x21b   :  { %626 = vperm.xlu1 %1073, %v588_v17   ;;  %1055 = vmatprep.subr.mxu0 %v1201_v25 }
 0x21c   :  { %1056 = vmatpush3.msra.mxu0 %v831_v40 }
 0x272   :  { %v699_v42 = vpop.permute.xlu1 %698 }
 0x273   :  { %v726_v43 = vmul.f32 %v699_v42, %v1275_v7 }
 0x275   :  { %v740_v21 = vsel %vm89_vm0, %v726_v43, 0.0  ;;  %v695_v44 = vpop.permute.xlu0 %694 }
 0x276   :  { %v741_v45 = vrot.slane %v740_v21, 4  ;;  %v725_v46 = vmul.f32 %v695_v44, %v1262_v2 }
 0x278   :  { %v742_v47 = vadd.f32 %v741_v45, %v740_v21  ;;  %v733_v48 = vsel %vm89_vm0, %v725_v46, 0.0  ;;  %v703_v49 = vpop.permute.xlu1 %702 }
 0x279   :  { %v734_v51 = vrot.slane %v733_v48, 4  ;;  %v727_v27 = vmul.f32 %v703_v49, %v1283_v9  ;;  %v707_v52 = vpop.permute.xlu0 %706 }
 0x27a   :  { %v743_v53 = vrot.slane %v742_v47, 2  ;;  %v728_v54 = vmul.f32 %v707_v52, %v1295_v11 }
 0x27b   :  { %v735_v55 = vadd.f32 %v734_v51, %v733_v48  ;;  %v747_v56 = vsel %vm89_vm0, %v727_v27, 0.0 }
 0x27c   :  { %v744_v34 = vadd.f32 %v743_v53, %v742_v47  ;;  %v748_v57 = vrot.slane %v747_v56, 4  ;;  %v754_v58 = vsel %vm89_vm0, %v728_v54, 0.0 }
 0x27d   :  { %v736_v59 = vrot.slane %v735_v55, 2  ;;  %v755_v41 = vrot.slane %v754_v58, 4  ;;  %v711_v62 = vpop.permute.xlu1 %710  ;;  %v715_v1 = vpop.permute.xlu0 %714 }
 0x27e   :  { %v749_v50 = vadd.f32 %v748_v57, %v747_v56  ;;  %v729_v60 = vmul.f32 %v711_v62, %v1300_v12  ;;  %v730_v5 = vmul.f32 %v715_v1, %v1309_v13  ;;  %v745_v16 = vrot.slane %v744_v34, 1 }
 0x27f   :  { %v737_v6 = vadd.f32 %v736_v59, %v735_v55  ;;  %v756_v10 = vadd.f32 %v755_v41, %v754_v58 }
 0x280   :  { %v750_v18 = vrot.slane %v749_v50, 2  ;;  %v761_v19 = vsel %vm89_vm0, %v729_v60, 0.0  ;;  %v768_v20 = vsel %vm89_vm0, %v730_v5, 0.0  ;;  %v746_v17 = vadd.f32 %v745_v16, %v744_v34 }
 0x281   :  { %v738_v22 = vrot.slane %v737_v6, 1  ;;  %v757_v23 = vrot.slane %v756_v10, 2  ;;  %v762_v24 = vrot.slane %v761_v19, 4  ;;  %v769_v26 = vrot.slane %v768_v20, 4  ;;  %v719_v4 = vpop.permute.xlu1 %718  ;;  %v723_v28 = vpop.permute.xlu0 %722 }
 0x282   :  { %v751_v29 = vadd.f32 %v750_v18, %v749_v50  ;;  %v731_v31 = vmul.f32 %v719_v4, %v1314_v14  ;;  %v732_v32 = vmul.f32 %v723_v28, %v1323_v15 }
 0x283   :  { %v739_v61 = vadd.f32 %v738_v22, %v737_v6  ;;  %v758_v33 = vadd.f32 %v757_v23, %v756_v10  ;;  %v763_v35 = vadd.f32 %v762_v24, %v761_v19  ;;  %v770_v63 = vadd.f32 %v769_v26, %v768_v20 }
 0x284   :  { %v752_v8 = vrot.slane %v751_v29, 1  ;;  %v775_v3 = vsel %vm89_vm0, %v731_v31, 0.0  ;;  %v782_v30 = vsel %vm89_vm0, %v732_v32, 0.0 }
 0x285   :  { %v759_v36 = vrot.slane %v758_v33, 1  ;;  %v764_v37 = vrot.slane %v763_v35, 2  ;;  %v771_v38 = vrot.slane %v770_v63, 2  ;;  %v820_v0 = vsel %vm797_vm3, %v746_v17, %v739_v61 }
 0x286   :  { %v753_v39 = vadd.f32 %v752_v8, %v751_v29  ;;  %v776_v40 = vrot.slane %v775_v3, 4  ;;  %v783_v42 = vrot.slane %v782_v30, 4  ;;  %v592_v43 = vpop.permute.xlu1 %591  ;;  %v597_v21 = vpop.permute.xlu0 %596 }
 0x287   :  { %v760_v44 = vadd.f32 %v759_v36, %v758_v33  ;;  %v765_v45 = vadd.f32 %v764_v37, %v763_v35  ;;  %v772_v46 = vadd.f32 %v771_v38, %v770_v63  ;;  %v629_v47 = vmul.f32 %v592_v43, %v1262_v2 }
 0x288   :  { %v821_v48 = vsel %vm799_vm4, %v753_v39, %v820_v0  ;;  %v777_v49 = vadd.f32 %v776_v40, %v775_v3  ;;  %v784_v51 = vadd.f32 %v783_v42, %v782_v30  ;;  %v630_v27 = vmul.f32 %v597_v21, %v1275_v7 }
 0x289   :  { %v766_v52 = vrot.slane %v765_v45, 1  ;;  %v773_v53 = vrot.slane %v772_v46, 1  ;;  %v637_v54 = vsel %vm89_vm0, %v629_v47, 0.0  ;;  %v822_v55 = vsel %vm801_vm5, %v760_v44, %v821_v48 }
 0x28a   :  { %v778_v56 = vrot.slane %v777_v49, 2  ;;  %v785_v34 = vrot.slane %v784_v51, 2  ;;  %v638_v57 = vrot.slane %v637_v54, 4  ;;  %v644_v58 = vsel %vm89_vm0, %v630_v27, 0.0  ;;  %v602_v59 = vpop.permute.xlu1 %601  ;;  %v612_v2 = vpop.permute.xlu0 %611 }
 0x28b   :  { %v767_v41 = vadd.f32 %v766_v52, %v765_v45  ;;  %v774_v62 = vadd.f32 %v773_v53, %v772_v46  ;;  %v645_v1 = vrot.slane %v644_v58, 4  ;;  %v631_v7 = vmul.f32 %v602_v59, %v1283_v9 }
 0x28c   :  { %v779_v50 = vadd.f32 %v778_v56, %v777_v49  ;;  %v786_v60 = vadd.f32 %v785_v34, %v784_v51  ;;  %v639_v5 = vadd.f32 %v638_v57, %v637_v54  ;;  %v633_v6 = vmul.f32 %v612_v2, %v1300_v12 }
 0x28d   :  { %v646_v10 = vadd.f32 %v645_v1, %v644_v58  ;;  %v651_v16 = vsel %vm89_vm0, %v631_v7, 0.0  ;;  %v823_v18 = vsel %vm803_vm6, %v767_v41, %v822_v55 }
 0x28e   :  { %v780_v19 = vrot.slane %v779_v50, 1  ;;  %v787_v20 = vrot.slane %v786_v60, 1  ;;  %v640_v22 = vrot.slane %v639_v5, 2  ;;  %v652_v23 = vrot.slane %v651_v16, 4  ;;  %v607_v24 = vpop.permute.xlu1 %606  ;;  %v622_v26 = vpop.permute.xlu0 %621 }
 0x28f   :  { %v647_v9 = vrot.slane %v646_v10, 2  ;;  %v665_v4 = vsel %vm89_vm0, %v633_v6, 0.0  ;;  %v632_v12 = vmul.f32 %v607_v24, %v1295_v11  ;;  %v635_v28 = vmul.f32 %v622_v26, %v1314_v14 }
 0x290   :  { %v781_v29 = vadd.f32 %v780_v19, %v779_v50  ;;  %v641_v31 = vadd.f32 %v640_v22, %v639_v5  ;;  %v653_v32 = vadd.f32 %v652_v23, %v651_v16  ;;  %v666_v61 = vrot.slane %v665_v4, 4 }
 0x291   :  { %v648_v33 = vadd.f32 %v647_v9, %v646_v10  ;;  %v658_v35 = vsel %vm89_vm0, %v632_v12, 0.0  ;;  %v679_v63 = vsel %vm89_vm0, %v635_v28, 0.0  ;;  %v788_v17 = vadd.f32 %v787_v20, %v786_v60  ;;  %v954_v28 = vld [vmem:[%s1490_s7] ss:$0 sm:$0xff] }
 0x292   :  { %v642_v8 = vrot.slane %v641_v31, 1  ;;  %v654_v3 = vrot.slane %v653_v32, 2  ;;  %v667_v25 = vadd.f32 %v666_v61, %v665_v4  ;;  %v659_v30 = vrot.slane %v658_v35, 4  ;;  %v617_v36 = vpop.permute.xlu1 %616 }
 0x293   :  { %v649_v37 = vrot.slane %v648_v33, 1  ;;  %v680_v38 = vrot.slane %v679_v63, 4  ;;  %v634_v11 = vmul.f32 %v617_v36, %v1309_v13  ;;  %v824_v14 = vsel %vm805_vm7, %v774_v62, %v823_v18 }
 0x294   :  { %v643_v0 = vadd.f32 %v642_v8, %v641_v31  ;;  %v655_v39 = vadd.f32 %v654_v3, %v653_v32  ;;  %v668_v40 = vrot.slane %v667_v25, 2  ;;  %v660_v42 = vadd.f32 %v659_v30, %v658_v35 }
 0x295   :  { %v650_v43 = vadd.f32 %v649_v37, %v648_v33  ;;  %v681_v21 = vadd.f32 %v680_v38, %v679_v63  ;;  %v672_v44 = vsel %vm89_vm0, %v634_v11, 0.0  ;;  %v825_v45 = vsel %vm807_vm8, %v781_v29, %v824_v14 }
 0x296   :  { %v656_v46 = vrot.slane %v655_v39, 1  ;;  %v669_v47 = vadd.f32 %v668_v40, %v667_v25  ;;  %v661_v48 = vrot.slane %v660_v42, 2  ;;  %v673_v49 = vrot.slane %v672_v44, 4  ;;  %v627_v51 = vpop.permute.xlu1 %626 }
 0x297   :  { %v682_v27 = vrot.slane %v681_v21, 2  ;;  %v826_v13 = vsel %vm809_vm9, %v788_v17, %v825_v45  ;;  %v636_v52 = vmul.f32 %v627_v51, %v1323_v15  ;;  %v798_v56 = vsel %vm797_vm3, %v650_v43, %v643_v0 }
 0x298   :  { %v657_v53 = vadd.f32 %v656_v46, %v655_v39  ;;  %v662_v54 = vadd.f32 %v661_v48, %v660_v42  ;;  %v674_v55 = vadd.f32 %v673_v49, %v672_v44  ;;  %827 = vrot.lane.b32.xlu0 %v826_v13, %s1203_s5  ;;  %v670_v34 = vrot.slane %v669_v47, 1 }
 0x299   :  { %v683_v57 = vadd.f32 %v682_v27, %v681_v21  ;;  %v686_v58 = vsel %vm89_vm0, %v636_v52, 0.0 }
 0x29a   :  { %v800_v59 = vsel %vm799_vm4, %v657_v53, %v798_v56  ;;  %v663_v2 = vrot.slane %v662_v54, 1  ;;  %v675_v41 = vrot.slane %v674_v55, 2  ;;  %v687_v62 = vrot.slane %v686_v58, 4 }
 0x29b   :  { %v671_v50 = vadd.f32 %v670_v34, %v669_v47  ;;  %v684_v15 = vrot.slane %v683_v57, 1 }
 0x29c   :  { %v664_v1 = vadd.f32 %v663_v2, %v662_v54  ;;  %v676_v7 = vadd.f32 %v675_v41, %v674_v55  ;;  %v688_v60 = vadd.f32 %v687_v62, %v686_v58 }
 0x29d   :  { %v685_v19 = vadd.f32 %v684_v15, %v683_v57 }
 0x29e   :  { %v802_v5 = vsel %vm801_vm5, %v664_v1, %v800_v59  ;;  %v677_v6 = vrot.slane %v676_v7, 1  ;;  %v689_v10 = vrot.slane %v688_v60, 2 }
 0x29f   :  { %v804_v16 = vsel %vm803_vm6, %v671_v50, %v802_v5 }
 0x2a0   :  { %v678_v18 = vadd.f32 %v677_v6, %v676_v7  ;;  %v690_v20 = vadd.f32 %v689_v10, %v688_v60 }
 0x2a2   :  { %v806_v22 = vsel %vm805_vm7, %v678_v18, %v804_v16  ;;  %v691_v23 = vrot.slane %v690_v20, 1 }
 0x2a3   :  { %v808_v24 = vsel %vm807_vm8, %v685_v19, %v806_v22 }
 0x2a4   :  { %v692_v26 = vadd.f32 %v691_v23, %v690_v20 }
 0x2a6   :  { %v810_v9 = vsel %vm809_vm9, %v692_v26, %v808_v24 }
 0x30a   :  { %v828_v4 = vpop.permute.xlu0 %827 }
 0x30b   :  { %v830_v12 = vsel %vm89_vm0, %v810_v9, %v828_v4 }
 0x30c   :  { %1058 = vmatmul.mubr.msk.f32.vlgmr.msra.gmra.mxu0 %vm242_vm1, %v830_v12 }
 0x3cc   :  { %v915_v29 = vpop.f32.mrf.mxu0 }
 0x3cd   :  { %v916_v31 = vadd.f32 %v954_v28, %v915_v29 }
 0x3ce   :  { %v1059_v32 = vpop.f32.mrf.mxu0 }
 0x3cf   :  { %919 = vst [vmem:[#allocation8] sm:$0xff] %v916_v31 }
 0x3d0   :  { %1179 = shalt.err (!%p1176_p5)
}
 0x3d1   :  { %929 = dma.vmem_to_hbm [thread:$0]  %s927_s30, 128, %s1491_s8, [#allocation4]  }
 0x3d2   :  { %1192 = dma.done.wait [#allocation4], 128  }
 0x3d3   :  { %1193 = vsyncadd [#allocation4], 4294967168 }
 0x3d4   :  { %933 = vsyncpa [#allocation3], 1 }
 0x3d5   :  { %934 = vsyncpa [#allocation6], 1 }
 0x3d6   :  { %935 = vsyncpa [#allocation4], 1 }

</bundles_post_ra>
